<compile_context>
chip_gen: v6e
topology: v6e:2x2x1
jax: 0.10.0
libtpu: 0.0.40
codegen_flags: <defaults>
</compile_context>

<pallas_src>
import jax
import jax.numpy as jnp
from jax.experimental import pallas as pl
from jax.experimental.pallas import tpu as pltpu

ALPHA = 0.25
GAMMA = 2.0  # hard-coded as an explicit square inside the kernel

LANES = 128


def _focal_loss_kernel(x_ref, t_ref, o_ref):
    x = x_ref[...].astype(jnp.float32)
    t = t_ref[...].astype(jnp.float32)

    # Single exponential per element; everything else derived from it.
    #   e          = exp(-|x|)                       (EUP)
    #   sigmoid(x) = where(x >= 0, 1, e) / (1 + e)
    #   bce(x, t)  = max(x, 0) - x*t + log1p(e)      (EUP log1p)
    e = jnp.exp(-jnp.abs(x))
    inv_1pe = 1.0 / (1.0 + e)
    p = jnp.where(x >= 0.0, 1.0, e) * inv_1pe

    ce = jnp.maximum(x, 0.0) - x * t + jnp.log1p(e)

    # q = 1 - p_t = p*(1 - t) + (1 - p)*t   (valid for soft targets as well)
    q = p * (1.0 - t) + (1.0 - p) * t

    # gamma == 2 -> q*q (one VALU mul) instead of pow (log+exp on EUP).
    alpha_t = ALPHA * t + (1.0 - ALPHA) * (1.0 - t)
    o_ref[...] = (alpha_t * ce * q * q).astype(o_ref.dtype)


def focal_loss(inputs, targets, *, tile_rows=2048):
    """Sigmoid focal loss, reduction='none'. Output matches input shape/dtype."""
    assert inputs.shape == targets.shape
    orig_shape = inputs.shape
    out_dtype = inputs.dtype

    total = int(inputs.size)
    itemsize = jnp.dtype(inputs.dtype).itemsize
    # Sublane granularity matches dtype packing: 8 (f32), 16 (bf16), 32 (int8/fp8).
    sub = max(8, 32 // itemsize)
    chunk = sub * LANES

    x_flat = jnp.ravel(inputs)
    t_flat = jnp.ravel(targets)

    padded_total = ((total + chunk - 1) // chunk) * chunk
    ragged = padded_total != total
    if ragged:
        # TODO(synk): move ragged-tail handling into the kernel (masked last-block
        # stores) to avoid these full-array pad/slice HBM copies for unaligned sizes.
        pad = padded_total - total
        x_flat = jnp.pad(x_flat, (0, pad))
        t_flat = jnp.pad(t_flat, (0, pad))

    rows = padded_total // LANES
    x2d = x_flat.reshape(rows, LANES)
    t2d = t_flat.reshape(rows, LANES)

    # Large fixed block (~1 MiB/array for f32); clamp to the sublane-rounded row
    # count so small inputs still lower, and use cdiv so odd row counts never
    # degrade to tiny blocks.
    tile_m = min(tile_rows, rows)
    tile_m = ((tile_m + sub - 1) // sub) * sub
    grid = (pl.cdiv(rows, tile_m),)

    out2d = pl.pallas_call(
        _focal_loss_kernel,
        out_shape=jax.ShapeDtypeStruct((rows, LANES), out_dtype),
        grid_spec=pltpu.PrefetchScalarGridSpec(
            num_scalar_prefetch=0,
            grid=grid,
            in_specs=[
                pl.BlockSpec((tile_m, LANES), lambda i: (i, 0)),
                pl.BlockSpec((tile_m, LANES), lambda i: (i, 0)),
            ],
            out_specs=pl.BlockSpec((tile_m, LANES), lambda i: (i, 0)),
        ),
        compiler_params=pltpu.CompilerParams(
            dimension_semantics=("parallel",),
        ),
    )(x2d, t2d)

    out_flat = out2d.reshape(-1)
    if ragged:
        out_flat = out_flat[:total]
    return out_flat.reshape(orig_shape)


def _reference_focal_loss(inputs, targets, alpha=ALPHA, gamma=GAMMA):
    x = inputs.astype(jnp.float32)
    t = targets.astype(jnp.float32)
    p = jax.nn.sigmoid(x)
    ce = jnp.maximum(x, 0.0) - x * t + jnp.log1p(jnp.exp(-jnp.abs(x)))
    p_t = p * t + (1.0 - p) * (1.0 - t)
    loss = ce * ((1.0 - p_t) ** gamma)
    alpha_t = alpha * t + (1.0 - alpha) * (1.0 - t)
    return (alpha_t * loss).astype(inputs.dtype)


if __name__ == "__main__":
    key = jax.random.PRNGKey(0)
    k1, k2, k3, k4 = jax.random.split(key, 4)

    # 1) Objectness-style logits: N=2, C=4 anchors, H=W=16 (NCHW). Aligned path.
    shape = (2, 4, 16, 16)
    inputs = jax.random.normal(k1, shape, dtype=jnp.float32) * 2.0
    targets = (jax.random.uniform(k2, shape) > 0.7).astype(jnp.float32)

    out = jax.block_until_ready(focal_loss(inputs, targets))
    ref = _reference_focal_loss(inputs, targets)
    assert out.shape == inputs.shape and out.dtype == inputs.dtype
    assert jnp.allclose(out, ref, atol=1e-5, rtol=1e-5), "f32 mismatch vs reference"

    # 2) Unaligned element count exercises the padded/ragged path.
    shape2 = (2, 3, 7, 5)
    inputs2 = jax.random.normal(k3, shape2, dtype=jnp.float32) * 2.0
    targets2 = (jax.random.uniform(k4, shape2) > 0.7).astype(jnp.float32)
    out2 = jax.block_until_ready(focal_loss(inputs2, targets2))
    ref2 = _reference_focal_loss(inputs2, targets2)
    assert out2.shape == inputs2.shape and out2.dtype == inputs2.dtype
    assert jnp.allclose(out2, ref2, atol=1e-5, rtol=1e-5), "ragged mismatch vs reference"

    # 3) bf16 passthrough (half the HBM bytes, 16-row sublane granularity).
    inputs3 = inputs.astype(jnp.bfloat16)
    targets3 = targets.astype(jnp.bfloat16)
    out3 = jax.block_until_ready(focal_loss(inputs3, targets3))
    ref3 = _reference_focal_loss(inputs3, targets3)
    assert out3.shape == inputs3.shape and out3.dtype == jnp.bfloat16
    assert jnp.allclose(out3.astype(jnp.float32), ref3.astype(jnp.float32),
                        atol=1e-2, rtol=5e-2), "bf16 mismatch vs reference"

    print("KERNEL_OK")
</pallas_src>

<mosaic_0001>
module attributes {stable_mosaic.version = 11 : i64} {
  func.func @_focal_loss_kernel(%arg0: i32, %arg1: memref<16x128xf32, #tpu.memory_space<vmem>>, %arg2: memref<16x128xf32, #tpu.memory_space<vmem>>, %arg3: memref<16x128xf32, #tpu.memory_space<vmem>>) attributes {dimension_semantics = [#tpu.dimension_semantics<parallel>], iteration_bounds = array<i64: 1>, scalar_prefetch = 0 : i64, scratch_operands = 0 : i64, tpu.core_type = #tpu.core_type<tc>, window_params = [{transform_indices = @transform_0, window_bounds = array<i64: 16, 128>}, {transform_indices = @transform_1, window_bounds = array<i64: 16, 128>}, {transform_indices = @transform_2, window_bounds = array<i64: 16, 128>}]} {
    %c0 = arith.constant 0 : index
    %c0_0 = arith.constant 0 : index
    %0 = vector.load %arg1[%c0, %c0_0] : memref<16x128xf32, #tpu.memory_space<vmem>>, vector<16x128xf32>
    %c0_1 = arith.constant 0 : index
    %c0_2 = arith.constant 0 : index
    %1 = vector.load %arg2[%c0_1, %c0_2] : memref<16x128xf32, #tpu.memory_space<vmem>>, vector<16x128xf32>
    %2 = math.absf %0 : vector<16x128xf32>
    %cst = arith.constant 0.000000e+00 : f32
    %3 = vector.broadcast %cst : f32 to vector<16x128xf32>
    %4 = arith.subf %3, %2 : vector<16x128xf32>
    %5 = math.exp %4 : vector<16x128xf32>
    %cst_3 = arith.constant 1.000000e+00 : f32
    %6 = vector.broadcast %cst_3 : f32 to vector<16x128xf32>
    %7 = arith.addf %6, %5 : vector<16x128xf32>
    %cst_4 = arith.constant 1.000000e+00 : f32
    %8 = vector.broadcast %cst_4 : f32 to vector<16x128xf32>
    %9 = arith.divf %8, %7 : vector<16x128xf32>
    %cst_5 = arith.constant 0.000000e+00 : f32
    %10 = vector.broadcast %cst_5 : f32 to vector<16x128xf32>
    %11 = arith.cmpf oge, %0, %10 : vector<16x128xf32>
    %cst_6 = arith.constant 1.000000e+00 : f32
    %12 = vector.broadcast %cst_6 : f32 to vector<16x128xf32>
    %13 = arith.select %11, %12, %5 : vector<16x128xi1>, vector<16x128xf32>
    %14 = arith.mulf %13, %9 : vector<16x128xf32>
    %cst_7 = arith.constant 0.000000e+00 : f32
    %15 = vector.broadcast %cst_7 : f32 to vector<16x128xf32>
    %16 = arith.maximumf %0, %15 : vector<16x128xf32>
    %17 = arith.mulf %0, %1 : vector<16x128xf32>
    %18 = arith.subf %16, %17 : vector<16x128xf32>
    %19 = math.log1p %5 : vector<16x128xf32>
    %20 = arith.addf %18, %19 : vector<16x128xf32>
    %cst_8 = arith.constant 1.000000e+00 : f32
    %21 = vector.broadcast %cst_8 : f32 to vector<16x128xf32>
    %22 = arith.subf %21, %1 : vector<16x128xf32>
    %23 = arith.mulf %14, %22 : vector<16x128xf32>
    %cst_9 = arith.constant 1.000000e+00 : f32
    %24 = vector.broadcast %cst_9 : f32 to vector<16x128xf32>
    %25 = arith.subf %24, %14 : vector<16x128xf32>
    %26 = arith.mulf %25, %1 : vector<16x128xf32>
    %27 = arith.addf %23, %26 : vector<16x128xf32>
    %cst_10 = arith.constant 2.500000e-01 : f32
    %28 = vector.broadcast %cst_10 : f32 to vector<16x128xf32>
    %29 = arith.mulf %28, %1 : vector<16x128xf32>
    %cst_11 = arith.constant 1.000000e+00 : f32
    %30 = vector.broadcast %cst_11 : f32 to vector<16x128xf32>
    %31 = arith.subf %30, %1 : vector<16x128xf32>
    %cst_12 = arith.constant 7.500000e-01 : f32
    %32 = vector.broadcast %cst_12 : f32 to vector<16x128xf32>
    %33 = arith.mulf %32, %31 : vector<16x128xf32>
    %34 = arith.addf %29, %33 : vector<16x128xf32>
    %35 = arith.mulf %34, %20 : vector<16x128xf32>
    %36 = arith.mulf %35, %27 : vector<16x128xf32>
    %37 = arith.mulf %36, %27 : vector<16x128xf32>
    %c0_13 = arith.constant 0 : index
    %c0_14 = arith.constant 0 : index
    %38 = vector.load %arg3[%c0_13, %c0_14] : memref<16x128xf32, #tpu.memory_space<vmem>>, vector<16x128xf32>
    tpu.vector_store %arg3[%c0_13, %c0_14], %37 {strides = array<i32>} : memref<16x128xf32, #tpu.memory_space<vmem>>, vector<16x128xf32>,
    return
  }
  func.func @transform_0(%arg0: i32) -> (i32, i32) {
    %c0_i32 = arith.constant 0 : i32
    %c0_i32_0 = arith.constant 0 : i32
    return %arg0, %c0_i32 : i32, i32
  }
  func.func @transform_1(%arg0: i32) -> (i32, i32) {
    %c0_i32 = arith.constant 0 : i32
    %c0_i32_0 = arith.constant 0 : i32
    return %arg0, %c0_i32 : i32, i32
  }
  func.func @transform_2(%arg0: i32) -> (i32, i32) {
    %c0_i32 = arith.constant 0 : i32
    %c0_i32_0 = arith.constant 0 : i32
    return %arg0, %c0_i32 : i32, i32
  }
}

</mosaic_0001>

<bundles_post_ra>
// kernel: tpu_custom_call.1
= control target key start
LH: loop header
LB: loop body
LE: loop exit
PB: predicated region body
PF: predicated region fallthrough
CT: control target
= control target key end

     0   :  { %7 = vsyncpa [#allocation3], 0  ;;  %s253_s0 = inlined_call_operand.hbm [shape: f32[16,128], index: 0, kind: input, shape index: {}]   ;;  %s254_s1 = inlined_call_operand.hbm [shape: f32[16,128], index: 1, kind: input, shape index: {}]   ;;  %s255_s2 = inlined_call_operand.hbm [shape: f32[16,128], index: 2, kind: output, shape index: {}]  }
   0x1   :  { %8 = vsyncpa [#allocation6], 0 }
   0x2   :  { %9 = vsyncpa [#allocation4], 0  ;;  %s215_s9 = smov [#allocation2]  }
   0x3   :  { %s15_s10 = sshll.u32 %s215_s9, 4  ;;  %s16_s10 = int_to_ptr.vmem [resolvable:$true] %s15_s10 }
   0x4   :  { %s157_s11 = scalar_lea.vmem %s16_s10, 256  ;;  %p162_p1 = scmp.lt.s32.totalorder %s16_s10, %s16_s10 }
   0x5   :  { %p158_p0 = scmp.ne.s32.totalorder %s16_s10, %s157_s11  ;;  %p163_p2 = scmp.lt.s32.totalorder %s157_s11, %s157_s11 }
   0x7   :  { %p164_p3 = por %p163_p2, %p162_p1 }
   0x9   :  { %p165_p4 = pnand %p164_p3, %p158_p0 }
   0xb   :  { %168 = shalt.err (!%p165_p4)
}
   0xc   :  { %s216_s12 = smov 128   ;;  %s217_s13 = smov 8  }
   0xd   :  { %21 = dma.hbm_to_vmem [thread:$0]  %s253_s0, 256, %s16_s10, [#allocation3], %s216_s12, %s216_s12, %s217_s13  }
   0xe   :  { %s218_s16 = smov [#allocation5]  }
   0xf   :  { %s27_s17 = sshll.u32 %s218_s16, 4  ;;  %s28_s17 = int_to_ptr.vmem [resolvable:$true] %s27_s17 }
  0x10   :  { %s177_s18 = scalar_lea.vmem %s28_s17, 256  ;;  %p182_p6 = scmp.lt.s32.totalorder %s28_s17, %s28_s17 }
  0x11   :  { %p178_p5 = scmp.ne.s32.totalorder %s28_s17, %s177_s18  ;;  %p183_p7 = scmp.lt.s32.totalorder %s177_s18, %s177_s18 }
  0x13   :  { %p184_p8 = por %p183_p7, %p182_p6 }
  0x15   :  { %p185_p9 = pnand %p184_p8, %p178_p5 }
  0x17   :  { %188 = shalt.err (!%p185_p9)
}
  0x18   :  { %33 = dma.hbm_to_vmem [thread:$0]  %s254_s1, 256, %s28_s17, [#allocation6], %s216_s12, %s216_s12, %s217_s13  }
  0x19   :  { %209 = dma.done.wait [#allocation3], 256  }
  0x1a   :  { %210 = vsyncadd [#allocation3], 4294967040 }
  0x1b   :  { %211 = dma.done.wait [#allocation6], 256  }
  0x1c   :  { %212 = vsyncadd [#allocation6], 4294967040  ;;  %v40_v0 = vld [vmem:[#allocation2] sm:$0xff]  ;;  %v41_v1 = vld [vmem:[#allocation2 + $0x8] sm:$0xff]  ;;  %s219_s0 = smov [#allocation7]  }
  0x1d   :  { %v44_v2 = vand.u32 2147483647, %v40_v0  ;;  %v45_v3 = vand.u32 2147483647, %v41_v1  ;;  %v42_v12 = vld [vmem:[#allocation5] sm:$0xff]  ;;  %v43_v14 = vld [vmem:[#allocation5 + $0x8] sm:$0xff] }
  0x1e   :  { %v90_v15 = vsub.f32 1.0, %v42_v12  ;;  %vm58_vm0 = vcmp.ge.f32.partialorder %v40_v0, 0.0  ;;  %v64_v17 = vmax.f32 %v40_v0, 0.0  ;;  %v66_v18 = vmul.f32 %v42_v12, %v40_v0  ;;  %s119_s1 = sshll.u32 %s219_s0, 4  ;;  %s120_s1 = int_to_ptr.vmem [resolvable:$true] %s119_s1 }
  0x1f   :  { %v46_v4 = vsub.f32 0.0, %v44_v2  ;;  %v47_v5 = vsub.f32 0.0, %v45_v3  ;;  %v91_v20 = vsub.f32 1.0, %v43_v14  ;;  %v100_v22 = vmul.f32 0.25, %v42_v12  ;;  %s189_s21 = scalar_lea.vmem %s120_s1, 256  ;;  %p194_p11 = scmp.lt.s32.totalorder %s120_s1, %s120_s1 }
  0x20   :  { %vm59_vm1 = vcmp.ge.f32.partialorder %v41_v1, 0.0  ;;  %v65_v23 = vmax.f32 %v41_v1, 0.0  ;;  %v102_v25 = vmul.f32 0.75, %v90_v15  ;;  %v67_v26 = vmul.f32 %v43_v14, %v41_v1  ;;  %p190_p10 = scmp.ne.s32.totalorder %s120_s1, %s189_s21  ;;  %p195_p12 = scmp.lt.s32.totalorder %s189_s21, %s189_s21 }
  0x21   :  { %v48_v6 = vmul.f32 1.442695, %v46_v4  ;;  %v50_v7 = vmul.f32 1.442695, %v47_v5  ;;  %v101_v32 = vmul.f32 0.25, %v43_v14  ;;  %v103_v33 = vmul.f32 0.75, %v91_v20 }
  0x22   :  { %v68_v36 = vsub.f32 %v64_v17, %v66_v18  ;;  %v104_v39 = vadd.f32 %v102_v25, %v100_v22  ;;  %v69_v40 = vsub.f32 %v65_v23, %v67_v26  ;;  %p196_p13 = por %p195_p12, %p194_p11 }
  0x23   :  { %137 = vpow2.f32 %v48_v6  ;;  %v105_v48 = vadd.f32 %v103_v33, %v101_v32 }
  0x24   :  { %139 = vpow2.f32 %v50_v7  ;;  %p197_p0 = pnand %p196_p13, %p190_p10 }
  0x30   :  { %v138_v8 = vpop.eup %137 }
  0x31   :  { %v140_v9 = vpop.eup %139  ;;  %v52_v10 = vadd.f32 1.0, %v138_v8  ;;  %v73_v13 = vmul.f32 -0.5, %v138_v8  ;;  %v76_v21 = vand.u32 2147483647, %v138_v8  ;;  %v60_v24 = vsel %vm58_vm0, 1.0, %v138_v8 }
  0x32   :  { %v53_v11 = vadd.f32 1.0, %v140_v9  ;;  %v82_v16 = vmul.f32 -0.5, %v140_v9  ;;  %v85_v28 = vand.u32 2147483647, %v140_v9  ;;  %v61_v31 = vsel %vm59_vm1, 1.0, %v140_v9 }
  0x33   :  { %141 = vrcp.f32 %v52_v10  ;;  %v74_v19 = vadd.f32 1.0, %v73_v13  ;;  %vm77_vm2 = vcmp.lt.f32.partialorder %v76_v21, 0.0004427343 }
  0x34   :  { %143 = vlog2.f32 %v52_v10  ;;  %v83_v27 = vadd.f32 1.0, %v82_v16  ;;  %vm86_vm3 = vcmp.lt.f32.partialorder %v85_v28, 0.0004427343 }
  0x35   :  { %145 = vrcp.f32 %v53_v11  ;;  %v75_v30 = vmul.f32 %v138_v8, %v74_v19 }
  0x36   :  { %147 = vlog2.f32 %v53_v11  ;;  %v84_v41 = vmul.f32 %v140_v9, %v83_v27 }
  0x40   :  { %v142_v29 = vpop.eup %141 }
  0x41   :  { %v144_v34 = vpop.eup %143  ;;  %v62_v35 = vmul.f32 %v142_v29, %v60_v24 }
  0x42   :  { %v146_v37 = vpop.eup %145  ;;  %v72_v38 = vmul.f32 0.6931472, %v144_v34 }
  0x43   :  { %v148_v42 = vpop.eup %147  ;;  %v92_v43 = vmul.f32 %v90_v15, %v62_v35  ;;  %v94_v44 = vsub.f32 1.0, %v62_v35  ;;  %v63_v45 = vmul.f32 %v146_v37, %v61_v31 }
  0x44   :  { %v78_v46 = vsel %vm77_vm2, %v75_v30, %v72_v38  ;;  %v81_v47 = vmul.f32 0.6931472, %v148_v42 }
  0x45   :  { %v88_v49 = vadd.f32 %v78_v46, %v68_v36  ;;  %v96_v50 = vmul.f32 %v94_v44, %v42_v12  ;;  %v93_v51 = vmul.f32 %v91_v20, %v63_v45  ;;  %v95_v52 = vsub.f32 1.0, %v63_v45 }
  0x46   :  { %v87_v53 = vsel %vm86_vm3, %v84_v41, %v81_v47 }
  0x47   :  { %v98_v54 = vadd.f32 %v96_v50, %v92_v43  ;;  %v106_v55 = vmul.f32 %v104_v39, %v88_v49  ;;  %v89_v56 = vadd.f32 %v87_v53, %v69_v40  ;;  %v97_v57 = vmul.f32 %v95_v52, %v43_v14 }
  0x49   :  { %v108_v58 = vmul.f32 %v106_v55, %v98_v54  ;;  %v99_v59 = vadd.f32 %v97_v57, %v93_v51  ;;  %v107_v60 = vmul.f32 %v105_v48, %v89_v56 }
  0x4b   :  { %v110_v61 = vmul.f32 %v108_v58, %v98_v54  ;;  %v109_v62 = vmul.f32 %v107_v60, %v99_v59 }
  0x4d   :  { %112 = vst [vmem:[#allocation7] sm:$0xff] %v110_v61  ;;  %v111_v63 = vmul.f32 %v109_v62, %v99_v59 }
  0x4f   :  { %113 = vst [vmem:[#allocation7 + $0x8] sm:$0xff] %v111_v63 }
  0x50   :  { %200 = shalt.err (!%p197_p0)
}
  0x51   :  { %125 = dma.vmem_to_hbm [thread:$0]  %s120_s1, 256, %s255_s2, [#allocation4], %s216_s12, %s216_s12, %s217_s13  }
  0x52   :  { %213 = dma.done.wait [#allocation4], 256  }
  0x53   :  { %214 = vsyncadd [#allocation4], 4294967040 }
  0x54   :  { %129 = vsyncpa [#allocation3], 1 }
  0x55   :  { %130 = vsyncpa [#allocation6], 1 }
  0x56   :  { %131 = vsyncpa [#allocation4], 1 }

</bundles_post_ra>
